<compile_context>
chip_gen: v7x
topology: tpu7x:2x2x1
jax: 0.10.0
libtpu: 0.0.40
codegen_flags: <defaults>
</compile_context>

<pallas_src>
import jax
import jax.numpy as jnp
from jax.experimental import pallas as pl
from jax.experimental.pallas import tpu as pltpu

HIDDEN = 600
HIDDEN_PAD = 640  # multiple of 128


def _vae_kernel(x_ref, w1_ref, b1_ref, w2_ref, b2_ref, wh_ref, bh_ref,
                noise_ref, out_ref):
    z_size = noise_ref.shape[1]

    x = x_ref[...]

    # --- Linear(T, 640) with BatchNorm1d(600) pre-folded into W/b ---
    h = jnp.dot(x, w1_ref[...].astype(jnp.float32),
                preferred_element_type=jnp.float32) + b1_ref[...]
    h = jnp.where(h >= 0, h, 0.1 * h)              # LeakyReLU(0.1)
    # Dropout -> identity in eval mode.
    # TODO(synk): train-mode dropout would use pltpu.prng_seed / prng_random_bits masking.

    # --- Linear(640, Z) with BatchNorm1d(Z) pre-folded ---
    h = jnp.dot(h, w2_ref[...].astype(jnp.float32),
                preferred_element_type=jnp.float32) + b2_ref[...]
    h = jnp.where(h >= 0, h, 0.1 * h)              # LeakyReLU(0.1)

    # --- fused heads: one matmul -> [mu | logsigma]  (B, 2Z) ---
    heads = jnp.dot(h, wh_ref[...].astype(jnp.float32),
                    preferred_element_type=jnp.float32) + bh_ref[...]
    mu = heads[:, :z_size]
    logsigma = heads[:, z_size:]

    # --- reparameterization ---
    z = noise_ref[...] * jnp.exp(0.5 * logsigma) + mu

    # Single output slab: [mu | logsigma | z]
    out_ref[:, 0:2 * z_size] = heads
    out_ref[:, 2 * z_size:3 * z_size] = z


def vae_forward(target, prepped, noise):
    """target: (B, T) f32; noise: (B, Z) f32 ~ N(0,1). Returns (mu, logsigma, z)."""
    B = target.shape[0]
    z_size = noise.shape[1]

    inputs = (
        target,
        prepped["w1"], prepped["b1"],
        prepped["w2"], prepped["b2"],
        prepped["wh"], prepped["bh"],
        noise,
    )

    vmem = pl.BlockSpec(memory_space=pltpu.MemorySpace.VMEM)
    out = pl.pallas_call(
        _vae_kernel,
        out_shape=jax.ShapeDtypeStruct((B, 3 * z_size), jnp.float32),
        in_specs=[vmem] * len(inputs),
        out_specs=vmem,
    )(*inputs)

    mu = out[:, :z_size]
    logsigma = out[:, z_size:2 * z_size]
    z = out[:, 2 * z_size:3 * z_size]
    return mu, logsigma, z


def init_vae_params(key, target_size, z_size, init_weight):
    """Raw params matching VAE.__init__: Linear weights ~ U(-w, w) (stored (in,out)),
    biases = 0, BatchNorm at PyTorch defaults (gamma=1, beta=0, rm=0, rv=1)."""
    k1, k2, k3, k4 = jax.random.split(key, 4)

    def linear_w(k, out_f, in_f):
        w = jax.random.uniform(k, (out_f, in_f), jnp.float32,
                               minval=-init_weight, maxval=init_weight)
        return jnp.transpose(w)  # (in, out)

    return {
        "w1": linear_w(k1, HIDDEN, target_size),
        "b1": jnp.zeros((HIDDEN,), jnp.float32),
        "g1": jnp.ones((HIDDEN,), jnp.float32),
        "be1": jnp.zeros((HIDDEN,), jnp.float32),
        "rm1": jnp.zeros((HIDDEN,), jnp.float32),
        "rv1": jnp.ones((HIDDEN,), jnp.float32),

        "w2": linear_w(k2, z_size, HIDDEN),
        "b2": jnp.zeros((z_size,), jnp.float32),
        "g2": jnp.ones((z_size,), jnp.float32),
        "be2": jnp.zeros((z_size,), jnp.float32),
        "rm2": jnp.zeros((z_size,), jnp.float32),
        "rv2": jnp.ones((z_size,), jnp.float32),

        "wmu": linear_w(k3, z_size, z_size),
        "bmu": jnp.zeros((z_size,), jnp.float32),
        "wls": linear_w(k4, z_size, z_size),
        "bls": jnp.zeros((z_size,), jnp.float32),
    }


def prepare_params(raw, eps_bn=1e-5):
    """Fold eval-mode BatchNorms into Linears, pad hidden 600->640, fuse heads,
    cast weights to bf16 (biases stay f32)."""
    # Fold BN1 into Linear1
    s1 = raw["g1"] * jax.lax.rsqrt(raw["rv1"] + eps_bn)
    w1 = raw["w1"] * s1[None, :]
    b1 = (raw["b1"] - raw["rm1"]) * s1 + raw["be1"]
    # Fold BN2 into Linear2
    s2 = raw["g2"] * jax.lax.rsqrt(raw["rv2"] + eps_bn)
    w2 = raw["w2"] * s2[None, :]
    b2 = (raw["b2"] - raw["rm2"]) * s2 + raw["be2"]

    # Zero-pad hidden dim to a lane-aligned multiple of 128.
    pad = HIDDEN_PAD - HIDDEN
    w1 = jnp.pad(w1, ((0, 0), (0, pad)))
    b1 = jnp.pad(b1, ((0, pad),))
    w2 = jnp.pad(w2, ((0, pad), (0, 0)))

    # Fuse the two heads into one matmul.
    wh = jnp.concatenate([raw["wmu"], raw["wls"]], axis=1)       # (Z, 2Z)
    bh = jnp.concatenate([raw["bmu"], raw["bls"]], axis=0)       # (2Z,)

    return {
        "w1": w1.astype(jnp.bfloat16),
        "b1": b1.reshape(1, -1).astype(jnp.float32),
        "w2": w2.astype(jnp.bfloat16),
        "b2": b2.reshape(1, -1).astype(jnp.float32),
        "wh": wh.astype(jnp.bfloat16),
        "bh": bh.reshape(1, -1).astype(jnp.float32),
    }


def _reference_prepped(target, p, noise):
    """Pure-JAX reference using the exact same prepared (folded/padded/bf16) params."""
    z_size = noise.shape[1]
    h = target @ p["w1"].astype(jnp.float32) + p["b1"]
    h = jnp.where(h >= 0, h, 0.1 * h)
    h = h @ p["w2"].astype(jnp.float32) + p["b2"]
    h = jnp.where(h >= 0, h, 0.1 * h)
    heads = h @ p["wh"].astype(jnp.float32) + p["bh"]
    mu, ls = heads[:, :z_size], heads[:, z_size:]
    z = noise * jnp.exp(0.5 * ls) + mu
    return mu, ls, z


def _reference_raw(target, raw, noise, eps_bn=1e-5):
    """Pure-JAX reference of the original eval-mode module (f32, explicit BN)."""
    h = target @ raw["w1"] + raw["b1"]
    h = (h - raw["rm1"]) * jax.lax.rsqrt(raw["rv1"] + eps_bn) * raw["g1"] + raw["be1"]
    h = jnp.where(h >= 0, h, 0.1 * h)
    h = h @ raw["w2"] + raw["b2"]
    h = (h - raw["rm2"]) * jax.lax.rsqrt(raw["rv2"] + eps_bn) * raw["g2"] + raw["be2"]
    h = jnp.where(h >= 0, h, 0.1 * h)
    mu = h @ raw["wmu"] + raw["bmu"]
    ls = h @ raw["wls"] + raw["bls"]
    z = noise * jnp.exp(0.5 * ls) + mu
    return mu, ls, z


if __name__ == "__main__":
    B = 8
    TARGET_SIZE = 32
    Z_SIZE = 16
    DROPOUT = 0.3      # unused in eval-mode forward
    INIT_W = 0.08

    root = jax.random.PRNGKey(0)
    k_params, k_x, k_noise = jax.random.split(root, 3)

    raw_params = init_vae_params(k_params, TARGET_SIZE, Z_SIZE, INIT_W)
    prepped = prepare_params(raw_params)

    x = jax.random.normal(k_x, (B, TARGET_SIZE), jnp.float32)
    noise = jax.random.normal(k_noise, (B, Z_SIZE), jnp.float32)

    mu, logsigma, z = vae_forward(x, prepped, noise)
    jax.block_until_ready((mu, logsigma, z))

    # Exact check: kernel vs pure-JAX on identical prepared params.
    mu_r, ls_r, z_r = _reference_prepped(x, prepped, noise)
    assert jnp.allclose(mu, mu_r, atol=1e-5, rtol=1e-5)
    assert jnp.allclose(logsigma, ls_r, atol=1e-5, rtol=1e-5)
    assert jnp.allclose(z, z_r, atol=1e-5, rtol=1e-5)

    # Semantic check vs the original (unfolded, f32) eval-mode module; the only
    # difference is bf16 weight quantization + BN-fold op reordering.
    mu_o, ls_o, z_o = _reference_raw(x, raw_params, noise)
    assert jnp.allclose(mu, mu_o, atol=1e-2, rtol=1e-2)
    assert jnp.allclose(logsigma, ls_o, atol=1e-2, rtol=1e-2)
    assert jnp.allclose(z, z_o, atol=1e-2, rtol=1e-2)

    print("KERNEL_OK")
</pallas_src>

<mosaic_0001>
module attributes {stable_mosaic.version = 11 : i64} {
  func.func @_vae_kernel(%arg0: memref<8x32xf32, #tpu.memory_space<vmem>>, %arg1: memref<32x640xbf16, #tpu.memory_space<vmem>>, %arg2: memref<1x640xf32, #tpu.memory_space<vmem>>, %arg3: memref<640x16xbf16, #tpu.memory_space<vmem>>, %arg4: memref<1x16xf32, #tpu.memory_space<vmem>>, %arg5: memref<16x32xbf16, #tpu.memory_space<vmem>>, %arg6: memref<1x32xf32, #tpu.memory_space<vmem>>, %arg7: memref<8x16xf32, #tpu.memory_space<vmem>>, %arg8: memref<8x48xf32, #tpu.memory_space<vmem>>) attributes {dimension_semantics = [], scalar_prefetch = 0 : i64, scratch_operands = 0 : i64, tpu.core_type = #tpu.core_type<tc>} {
    %c0 = arith.constant 0 : index
    %c0_0 = arith.constant 0 : index
    %0 = vector.load %arg0[%c0, %c0_0] : memref<8x32xf32, #tpu.memory_space<vmem>>, vector<8x32xf32>
    %c0_1 = arith.constant 0 : index
    %c0_2 = arith.constant 0 : index
    %1 = vector.load %arg1[%c0_1, %c0_2] : memref<32x640xbf16, #tpu.memory_space<vmem>>, vector<32x640xbf16>
    %2 = arith.extf %1 : vector<32x640xbf16> to vector<32x640xf32>
    %cst = arith.constant dense<0.000000e+00> : vector<8x640xf32>
    %3 = tpu.matmul %0, %2, %cst {dimension_numbers = #tpu.dot_dimension_numbers<[1], [0], [0], [1], [0, 0, 1, 1], [], []>} : vector<8x32xf32>, vector<32x640xf32>, vector<8x640xf32> -> vector<8x640xf32>
    %c0_3 = arith.constant 0 : index
    %c0_4 = arith.constant 0 : index
    %4 = vector.load %arg2[%c0_3, %c0_4] : memref<1x640xf32, #tpu.memory_space<vmem>>, vector<1x640xf32>
    %5 = vector.broadcast %4 : vector<1x640xf32> to vector<8x640xf32>
    %6 = arith.addf %3, %5 : vector<8x640xf32>
    %cst_5 = arith.constant 0.000000e+00 : f32
    %7 = vector.broadcast %cst_5 : f32 to vector<8x640xf32>
    %8 = arith.cmpf oge, %6, %7 : vector<8x640xf32>
    %cst_6 = arith.constant 1.000000e-01 : f32
    %9 = vector.broadcast %cst_6 : f32 to vector<8x640xf32>
    %10 = arith.mulf %9, %6 : vector<8x640xf32>
    %11 = arith.select %8, %6, %10 : vector<8x640xi1>, vector<8x640xf32>
    %c0_7 = arith.constant 0 : index
    %c0_8 = arith.constant 0 : index
    %12 = vector.load %arg3[%c0_7, %c0_8] : memref<640x16xbf16, #tpu.memory_space<vmem>>, vector<640x16xbf16>
    %13 = arith.extf %12 : vector<640x16xbf16> to vector<640x16xf32>
    %cst_9 = arith.constant dense<0.000000e+00> : vector<8x16xf32>
    %14 = tpu.matmul %11, %13, %cst_9 {dimension_numbers = #tpu.dot_dimension_numbers<[1], [0], [0], [1], [0, 0, 1, 1], [], []>} : vector<8x640xf32>, vector<640x16xf32>, vector<8x16xf32> -> vector<8x16xf32>
    %c0_10 = arith.constant 0 : index
    %c0_11 = arith.constant 0 : index
    %15 = vector.load %arg4[%c0_10, %c0_11] : memref<1x16xf32, #tpu.memory_space<vmem>>, vector<1x16xf32>
    %16 = vector.broadcast %15 : vector<1x16xf32> to vector<8x16xf32>
    %17 = arith.addf %14, %16 : vector<8x16xf32>
    %cst_12 = arith.constant 0.000000e+00 : f32
    %18 = vector.broadcast %cst_12 : f32 to vector<8x16xf32>
    %19 = arith.cmpf oge, %17, %18 : vector<8x16xf32>
    %cst_13 = arith.constant 1.000000e-01 : f32
    %20 = vector.broadcast %cst_13 : f32 to vector<8x16xf32>
    %21 = arith.mulf %20, %17 : vector<8x16xf32>
    %22 = arith.select %19, %17, %21 : vector<8x16xi1>, vector<8x16xf32>
    %c0_14 = arith.constant 0 : index
    %c0_15 = arith.constant 0 : index
    %23 = vector.load %arg5[%c0_14, %c0_15] : memref<16x32xbf16, #tpu.memory_space<vmem>>, vector<16x32xbf16>
    %24 = arith.extf %23 : vector<16x32xbf16> to vector<16x32xf32>
    %cst_16 = arith.constant dense<0.000000e+00> : vector<8x32xf32>
    %25 = tpu.matmul %22, %24, %cst_16 {dimension_numbers = #tpu.dot_dimension_numbers<[1], [0], [0], [1], [0, 0, 1, 1], [], []>} : vector<8x16xf32>, vector<16x32xf32>, vector<8x32xf32> -> vector<8x32xf32>
    %c0_17 = arith.constant 0 : index
    %c0_18 = arith.constant 0 : index
    %26 = vector.load %arg6[%c0_17, %c0_18] : memref<1x32xf32, #tpu.memory_space<vmem>>, vector<1x32xf32>
    %27 = vector.broadcast %26 : vector<1x32xf32> to vector<8x32xf32>
    %28 = arith.addf %25, %27 : vector<8x32xf32>
    %29 = vector.extract_strided_slice %28 {offsets = [0, 0], sizes = [8, 16], strides = [1, 1]} : vector<8x32xf32> to vector<8x16xf32>
    %30 = vector.extract_strided_slice %28 {offsets = [0, 16], sizes = [8, 16], strides = [1, 1]} : vector<8x32xf32> to vector<8x16xf32>
    %c0_19 = arith.constant 0 : index
    %c0_20 = arith.constant 0 : index
    %31 = vector.load %arg7[%c0_19, %c0_20] : memref<8x16xf32, #tpu.memory_space<vmem>>, vector<8x16xf32>
    %cst_21 = arith.constant 5.000000e-01 : f32
    %32 = vector.broadcast %cst_21 : f32 to vector<8x16xf32>
    %33 = arith.mulf %32, %30 : vector<8x16xf32>
    %34 = math.exp %33 : vector<8x16xf32>
    %35 = arith.mulf %31, %34 : vector<8x16xf32>
    %36 = arith.addf %35, %29 : vector<8x16xf32>
    %c0_22 = arith.constant 0 : index
    %c0_23 = arith.constant 0 : index
    %37 = vector.load %arg8[%c0_22, %c0_23] : memref<8x48xf32, #tpu.memory_space<vmem>>, vector<8x32xf32>
    tpu.vector_store %arg8[%c0_22, %c0_23], %28 {strides = array<i32>} : memref<8x48xf32, #tpu.memory_space<vmem>>, vector<8x32xf32>,
    %c0_24 = arith.constant 0 : index
    %c32 = arith.constant 32 : index
    %38 = vector.load %arg8[%c0_24, %c32] : memref<8x48xf32, #tpu.memory_space<vmem>>, vector<8x16xf32>
    tpu.vector_store %arg8[%c0_24, %c32], %36 {strides = array<i32>} : memref<8x48xf32, #tpu.memory_space<vmem>>, vector<8x16xf32>,
    return
  }
}

</mosaic_0001>

<bundles_post_ra>
// kernel: tpu_custom_call.1
= control target key start
LH: loop header
LB: loop body
LE: loop exit
PB: predicated region body
PF: predicated region fallthrough
CT: control target
= control target key end

     0   :  { %v1343_v2 = vmov 0.0   ;;  %vm90_vm0 = vcmask 261120   ;;  %s1597_s0 = inlined_call_operand.vmem [shape: f32[8,32], index: 0, kind: input, shape index: {}]   ;;  %s1598_s1 = inlined_call_operand.vmem [shape: bf16[32,640], index: 1, kind: input, shape index: {}]   ;;  %s1599_s2 = inlined_call_operand.vmem [shape: f32[1,640], index: 2, kind: input, shape index: {}]   ;;  %s1600_s3 = inlined_call_operand.vmem [shape: bf16[640,16], index: 3, kind: input, shape index: {}]   ;;  %s1601_s4 = inlined_call_operand.vmem [shape: f32[1,16], index: 4, kind: input, shape index: {}]   ;;  %s1602_s5 = inlined_call_operand.vmem [shape: bf16[16,32], index: 5, kind: input, shape index: {}]   ;;  %s1603_s6 = inlined_call_operand.vmem [shape: f32[1,32], index: 6, kind: input, shape index: {}]   ;;  %s1604_s7 = inlined_call_operand.vmem [shape: f32[8,16], index: 7, kind: input, shape index: {}]   ;;  %s1605_s8 = inlined_call_operand.hbm [shape: f32[8,48], index: 8, kind: output, shape index: {}]  }
   0x1   :  { %v1303_v0 = vld [vmem:[%s1598_s1 + $0x4] ss:$20 sps:$4 sm:$0xff]   ;;  %v1305_v1 = vld [vmem:[%s1598_s1] ss:$20 sps:$4 sm:$0xff]   ;;  %158 = vmatprep.mubr.f32.mxu0 %v1343_v2  ;;  %v1308_v4 = vld [vmem:[%s1598_s1 + $0x28] ss:$20 sps:$4 sm:$0xff]  }
   0x2   :  { %1175 = vmatprep.subr.bf16.mxu0 %v1303_v0  ;;  %v1306_v3 = vld [vmem:[%s1598_s1 + $0x2c] ss:$20 sps:$4 sm:$0xff]   ;;  %v1311_v7 = vld [vmem:[%s1598_s1 + $0x8] ss:$20 sps:$4 sm:$0xff]   ;;  %v1314_v13 = vld [vmem:[%s1598_s1 + $0x30] ss:$20 sps:$4 sm:$0xff]  }
   0x3   :  { %1177 = vmatpush1.bf16.msra.mxu0 %v1305_v1  ;;  %v1309_v5 = vld [vmem:[%s1598_s1 + $0xc] ss:$20 sps:$4 sm:$0xff]   ;;  %v1312_v9 = vld [vmem:[%s1598_s1 + $0x34] ss:$20 sps:$4 sm:$0xff]   ;;  %v1315_v16 = vld [vmem:[%s1598_s1 + $0x10] ss:$20 sps:$4 sm:$0xff]  }
   0x4   :  { %1179 = vmatprep.subr.bf16.mxu0 %v1306_v3  ;;  %v30_v6 = vld [vmem:[%s1597_s0] sm:$0xff]  ;;  %v995_v11 = vld [vmem:[%s1600_s3 + $0x48] sm:$0xff]   ;;  %v996_v14 = vld [vmem:[%s1600_s3 + $0x50] sm:$0xff]  }
   0x5   :  { %v994_v8 = vld [vmem:[%s1600_s3 + $0x40] sm:$0xff]   ;;  %v987_v12 = vld [vmem:[%s1600_s3 + $0x8] sm:$0xff]   ;;  %v988_v15 = vld [vmem:[%s1600_s3 + $0x10] sm:$0xff]  }
   0x6   :  { %1197 = vmatprep.subr.bf16.mxu1 %v994_v8  ;;  %v824_v10 = vld [vmem:[%s1600_s3] sm:$0xff]   ;;  %v997_v17 = vld [vmem:[%s1600_s3 + $0x58] sm:$0xff]  }
   0x7   :  { %1181 = vmatpush1.bf16.msra.mxu0 %v1308_v4  ;;  %1199 = vmatpush3.bf16.msra.mxu1 %v824_v10 }
   0x8   :  { %1183 = vmatprep.subr.bf16.mxu0 %v1309_v5  ;;  %1201 = vmatprep.subr.bf16.mxu1 %v995_v11 }
   0xa   :  { %817 = vmatmul.mubr.msk.f32.vlgmr.msra.gmra.mrb[0].mxu0 %vm90_vm0, %v30_v6 }
   0xb   :  { %1185 = vmatpush1.bf16.msra.mxu0 %v1311_v7  ;;  %229 = vmatprep.mubr.f32.mxu0 %v1343_v2 }
   0xc   :  { %1187 = vmatprep.subr.bf16.mxu0 %v1312_v9  ;;  %1203 = vmatpush3.bf16.msra.mxu1 %v987_v12 }
   0xd   :  { %1205 = vmatprep.subr.bf16.mxu1 %v996_v14 }
   0xf   :  { %1189 = vmatpush1.bf16.msra.mxu0 %v1314_v13 }
  0x10   :  { %13 = vsyncpa [#allocation3], 0  ;;  %v1344_v18 = vmov 0.0|0.0   ;;  %1207 = vmatpush3.bf16.msra.mxu1 %v988_v15  ;;  %v989_v19 = vld [vmem:[%s1600_s3 + $0x18] sm:$0xff]   ;;  %vm1345_vm1 = vmmov 0   ;;  %v998_v21 = vld [vmem:[%s1600_s3 + $0x60] sm:$0xff]   ;;  %v65_v45 = vlaneseq }
  0x11   :  { %1190 = vmatprep.subr.bf16.mxu0 %v1344_v18  ;;  %1209 = vmatprep.subr.bf16.mxu1 %v997_v17  ;;  %v1316_v20 = vld [vmem:[%s1598_s1 + $0x38] ss:$20 sps:$4 sm:$0xff]   ;;  %v1010_v22 = vld [vmem:[%s1600_s3 + $0xc0] sm:$0xff]   ;;  %v1000_v28 = vld [vmem:[%s1600_s3 + $0x70] sm:$0xff]   ;;  %vm712_vm8 = vcmask 130048   ;;  %s1347_s19 = smov 32  }
  0x12   :  { %818 = vmatmul.mubr.msk.f32.vlgmr.msra.gmra.mrb[2].mxu0 %vm90_vm0, %v30_v6  ;;  %v990_v23 = vld [vmem:[%s1600_s3 + $0x20] sm:$0xff]   ;;  %v999_v24 = vld [vmem:[%s1600_s3 + $0x68] sm:$0xff]   ;;  %v1012_v30 = vld [vmem:[%s1600_s3 + $0xd0] sm:$0xff]   ;;  %v66_v46 = vshrl.u32 %v65_v45, 7  ;;  %vm801_vm9 = vcmask 392448  }
  0x13   :  { %1192 = vmatpush3.bf16.msra.mxu0 %v1315_v16  ;;  %1129 = vmatprep.mubr.msk.f32.mxu0 %vm1345_vm1, %v1343_v2  ;;  %v1002_v25 = vld [vmem:[%s1600_s3 + $0x80] sm:$0xff]   ;;  %v1011_v26 = vld [vmem:[%s1600_s3 + $0xc8] sm:$0xff]   ;;  %v1004_v31 = vld [vmem:[%s1600_s3 + $0x90] sm:$0xff]  }
  0x14   :  { %1193 = vmatprep.subr.bf16.mxu0 %v1344_v18  ;;  %1211 = vmatpush3.bf16.msra.mxu1 %v989_v19  ;;  %v991_v27 = vld [vmem:[%s1600_s3 + $0x28] sm:$0xff]   ;;  %v1013_v32 = vld [vmem:[%s1600_s3 + $0xd8] sm:$0xff]   ;;  %v992_v34 = vld [vmem:[%s1600_s3 + $0x30] sm:$0xff]   ;;  %v67_v47 = vsub.s32 0, %v66_v46  ;;  %v71_v49 = vsub.s32 1, %v66_v46  ;;  %v75_v55 = vsub.s32 2, %v66_v46 }
  0x15   :  { %1213 = vmatprep.subr.bf16.mxu1 %v998_v21  ;;  %v1003_v29 = vld [vmem:[%s1600_s3 + $0x88] sm:$0xff]   ;;  %v1005_v33 = vld [vmem:[%s1600_s3 + $0x98] sm:$0xff]   ;;  %v1014_v35 = vld [vmem:[%s1600_s3 + $0xe0] sm:$0xff]   ;;  %v79_v57 = vsub.s32 3, %v66_v46  ;;  %v83_v16 = vsub.s32 4, %v66_v46 }
  0x16   :  { %v1006_v36 = vld [vmem:[%s1600_s3 + $0xa0] sm:$0xff]   ;;  %v1001_v37 = vld [vmem:[%s1600_s3 + $0x78] sm:$0xff]   ;;  %v1015_v39 = vld [vmem:[%s1600_s3 + $0xe8] sm:$0xff]  }
  0x17   :  { %1195 = vmatpush3.bf16.msra.mxu0 %v1316_v20  ;;  %v993_v38 = vld [vmem:[%s1600_s3 + $0x38] sm:$0xff]   ;;  %v1007_v40 = vld [vmem:[%s1600_s3 + $0xa8] sm:$0xff]   ;;  %v1016_v41 = vld [vmem:[%s1600_s3 + $0xf0] sm:$0xff]  }
  0x18   :  { %1229 = vmatprep.subr.bf16.mxu0 %v1010_v22  ;;  %1215 = vmatpush3.bf16.msra.mxu1 %v990_v23  ;;  %v1008_v42 = vld [vmem:[%s1600_s3 + $0xb0] sm:$0xff]   ;;  %v1017_v43 = vld [vmem:[%s1600_s3 + $0xf8] sm:$0xff]   ;;  %v63_v48 = vld [vmem:[%s1599_s2] sm:$0x1f] }
  0x19   :  { %1217 = vmatprep.subr.bf16.mxu1 %v999_v24  ;;  %v1009_v44 = vld [vmem:[%s1600_s3 + $0xb8] sm:$0xff]   ;;  %v68_v50 = vrot.slane %v63_v48, %v67_v47  ;;  %v72_v51 = vrot.slane %v63_v48, %v71_v49  ;;  %v76_v60 = vrot.slane %v63_v48, %v75_v55  ;;  %v1018_v62 = vld [vmem:[%s1600_s3 + $0x100] sm:$0xff]   ;;  %v80_v63 = vrot.slane %v63_v48, %v79_v57  ;;  %v1020_v11 = vld [vmem:[%s1600_s3 + $0x110] sm:$0xff]  }
  0x1a   :  { %1130 = vmatmul.mubr.msk.f32.vlgmr.msra.gmra.mrb[4].mxu0 %vm90_vm0, %v30_v6  ;;  %v1019_v6 = vld [vmem:[%s1600_s3 + $0x108] sm:$0xff]   ;;  %v1021_v14 = vld [vmem:[%s1600_s3 + $0x118] sm:$0xff]   ;;  %v1022_v15 = vld [vmem:[%s1600_s3 + $0x120] sm:$0xff]   ;;  %v84_v17 = vrot.slane %v63_v48, %v83_v16 }
  0x1b   :  { %1231 = vmatpush3.bf16.msra.mxu0 %v1002_v25  ;;  %v1024_v19 = vld [vmem:[%s1600_s3 + $0x130] sm:$0xff]   ;;  %v1025_v21 = vld [vmem:[%s1600_s3 + $0x138] sm:$0xff]   ;;  %v984_v24 = vld [vmem:[%s1602_s5] sm:$0xff]  }
  0x1c   :  { %1233 = vmatprep.subr.bf16.mxu0 %v1011_v26  ;;  %1219 = vmatpush3.bf16.msra.mxu1 %v991_v27  ;;  %v786_v45 = vld [vmem:[%s1604_s7] sm:$0xff] }
  0x1d   :  { %1221 = vmatprep.subr.bf16.mxu1 %v1000_v28 }
  0x1f   :  { %1235 = vmatpush3.bf16.msra.mxu0 %v1003_v29 }
  0x20   :  { %1237 = vmatprep.subr.bf16.mxu0 %v1012_v30  ;;  %1223 = vmatpush3.bf16.msra.mxu1 %v992_v34 }
  0x21   :  { %1225 = vmatprep.subr.bf16.mxu1 %v1001_v37 }
  0x23   :  { %1239 = vmatpush3.bf16.msra.mxu0 %v1004_v31 }
  0x24   :  { %1241 = vmatprep.subr.bf16.mxu0 %v1013_v32  ;;  %1227 = vmatpush3.bf16.msra.mxu1 %v993_v38  ;;  %v821_v38 = vld [vmem:[%s1603_s6] ss:$0 sm:$0xff]  ;;  %s1348_s6 = smov [#allocation2]  }
  0x25   :  { %1260 = vmatprep.subr.bf16.mxu1 %v1344_v18  ;;  %s809_s20 = sshll.u32 %s1348_s6, 4  ;;  %s810_s20 = int_to_ptr.vmem [resolvable:$true] %s809_s20 }
  0x26   :  { %s1319_s21 = scalar_lea.vmem %s810_s20, 128  ;;  %p1324_p1 = scmp.lt.s32.totalorder %s810_s20, %s810_s20 }
  0x27   :  { %1243 = vmatpush3.bf16.msra.mxu0 %v1005_v33  ;;  %p1320_p0 = scmp.ne.s32.totalorder %s810_s20, %s1319_s21  ;;  %p1325_p2 = scmp.lt.s32.totalorder %s1319_s21, %s1319_s21 }
  0x28   :  { %1245 = vmatprep.subr.bf16.mxu0 %v1014_v35 }
  0x29   :  { %p1326_p3 = por %p1325_p2, %p1324_p1 }
  0x2b   :  { %1247 = vmatpush3.bf16.msra.mxu0 %v1006_v36  ;;  %p1327_p4 = pnand %p1326_p3, %p1320_p0 }
  0x2c   :  { %1249 = vmatprep.subr.bf16.mxu0 %v1015_v39 }
  0x2f   :  { %1251 = vmatpush3.bf16.msra.mxu0 %v1007_v40 }
  0x30   :  { %1253 = vmatprep.subr.bf16.mxu0 %v1016_v41 }
  0x33   :  { %1255 = vmatpush3.bf16.msra.mxu0 %v1008_v42 }
  0x34   :  { %1257 = vmatprep.subr.bf16.mxu0 %v1017_v43 }
  0x37   :  { %1259 = vmatpush3.bf16.msra.mxu0 %v1009_v44 }
  0x38   :  { %1284 = vmatprep.subr.bf16.mxu0 %v1344_v18 }
  0xdd   :  { %v160_v52 = vpop.f32.mrb[0].mxu0 }
  0xde   :  { %v161_v53 = vadd.f32 %v160_v52, %v68_v50  ;;  %v162_v54 = vpop.f32.mrb[1].mxu0 }
  0xdf   :  { %v163_v56 = vadd.f32 %v162_v54, %v72_v51 }
  0xe0   :  { %v311_v58 = vmul.f32 0.1, %v161_v53  ;;  %vm306_vm3 = vcmp.ge.f32.partialorder %v161_v53, 0.0 }
  0xe1   :  { %vm307_vm2 = vcmp.ge.f32.partialorder %v163_v56, 0.0  ;;  %v312_v59 = vmul.f32 0.1, %v163_v56 }
  0xe2   :  { %v316_v0 = vsel %vm306_vm3, %v161_v53, %v311_v58 }
  0xe3   :  { %v317_v61 = vsel %vm307_vm2, %v163_v56, %v312_v59 }
  0xe4   :  { %552 = vmatprep.mubr.f32.mxu1 %v317_v61 }
  0xe5   :  { %v231_v1 = vpop.f32.mrb[2].mxu0  ;;  %553 = vmatmul.mubr.f32.vlgmr.msra.gmra.mrb[0].mxu1 %v316_v0 }
  0xe6   :  { %v232_v3 = vadd.f32 %v231_v1, %v76_v60  ;;  %1262 = vmatpush3.bf16.msra.mxu1 %v1018_v62  ;;  %v233_v4 = vpop.f32.mrb[3].mxu0  ;;  %1164 = vmatprep.mubr.msk.f32.mxu1 %vm1345_vm1, %v1343_v2 }
  0xe7   :  { %v234_v5 = vadd.f32 %v233_v4, %v80_v63  ;;  %1263 = vmatprep.subr.bf16.mxu1 %v1344_v18 }
  0xe8   :  { %vm308_vm4 = vcmp.ge.f32.partialorder %v232_v3, 0.0  ;;  %v313_v7 = vmul.f32 0.1, %v232_v3 }
  0xe9   :  { %v314_v8 = vmul.f32 0.1, %v234_v5  ;;  %vm309_vm5 = vcmp.ge.f32.partialorder %v234_v5, 0.0 }
  0xea   :  { %1265 = vmatpush3.bf16.msra.mxu1 %v1019_v6  ;;  %v318_v9 = vsel %vm308_vm4, %v232_v3, %v313_v7 }
  0xeb   :  { %v319_v10 = vsel %vm309_vm5, %v234_v5, %v314_v8  ;;  %1266 = vmatprep.subr.bf16.mxu1 %v1344_v18 }
  0xec   :  { %622 = vmatprep.mubr.f32.mxu0 %v319_v10 }
  0xed   :  { %623 = vmatmul.mubr.f32.vlgmr.msra.gmra.mrb[6].mxu0 %v318_v9  ;;  %v302_v12 = vpop.f32.mrb[4].mxu0 }
  0xee   :  { %1268 = vmatpush3.bf16.msra.mxu1 %v1020_v11  ;;  %v1131_v13 = vpop.f32.mrb[5].mxu0  ;;  %1171 = vmatprep.mubr.msk.f32.mxu0 %vm1345_vm1, %v1343_v2  ;;  %v1023_v2 = vld [vmem:[%s1600_s3 + $0x128] sm:$0xff]   ;;  %v303_v20 = vadd.f32 %v302_v12, %v84_v17 }
  0xef   :  { %1269 = vmatprep.subr.bf16.mxu1 %v1344_v18  ;;  %1286 = vmatpush3.bf16.msra.mxu0 %v984_v24 }
  0xf0   :  { %v315_v22 = vmul.f32 0.1, %v303_v20  ;;  %vm310_vm6 = vcmp.ge.f32.partialorder %v303_v20, 0.0 }
  0xf2   :  { %1271 = vmatpush3.bf16.msra.mxu1 %v1021_v14  ;;  %v320_v23 = vsel %vm310_vm6, %v303_v20, %v315_v22 }
  0xf3   :  { %1272 = vmatprep.subr.bf16.mxu1 %v1344_v18 }
  0xf6   :  { %1274 = vmatpush3.bf16.msra.mxu1 %v1022_v15 }
  0xf7   :  { %1275 = vmatprep.subr.bf16.mxu1 %v1344_v18 }
  0xfa   :  { %1277 = vmatpush3.bf16.msra.mxu1 %v1023_v2 }
  0xfb   :  { %1278 = vmatprep.subr.bf16.mxu1 %v1344_v18 }
  0xfe   :  { %1280 = vmatpush3.bf16.msra.mxu1 %v1024_v19 }
  0xff   :  { %1281 = vmatprep.subr.bf16.mxu1 %v1344_v18  ;;  %v820_v18 = vld [vmem:[%s1601_s4] ss:$0 sm:$0xff]  ;;  %s1346_s4 = smov 112  }
 0x102   :  { %1283 = vmatpush3.bf16.msra.mxu1 %v1025_v21 }
 0x105   :  { %1165 = vmatmul.mubr.f32.vlgmr.msra.gmra.mrb[2].mxu1 %v320_v23 }
 0x1b8   :  { %v1063_v25 = vpop.f32.mrb[0].mxu1 }
 0x1b9   :  { %v1064_v26 = vpop.f32.mrb[1].mxu1 }
 0x1ba   :  { %v1065_v27 = vadd.f32 %v1064_v26, %v1063_v25 }
 0x1bc   :  { %v555_v30 = vadd.f32 %v1065_v27, %v820_v18 }
 0x1c0   :  { %v1098_v28 = vpop.f32.mrb[6].mxu0 }
 0x1c1   :  { %v1099_v29 = vpop.f32.mrb[7].mxu0 }
 0x1c2   :  { %v1100_v31 = vadd.f32 %v1099_v29, %v1098_v28 }
 0x1c4   :  { %v625_v32 = vadd.f32 %v1100_v31, %v555_v30 }
 0x1d8   :  { %v694_v33 = vpop.f32.mrb[2].mxu1 }
 0x1d9   :  { %v695_v34 = vadd.f32 %v694_v33, %v625_v32  ;;  %v1166_v35 = vpop.f32.mrb[3].mxu1 }
 0x1db   :  { %vm698_vm7 = vcmp.ge.f32.partialorder %v695_v34, 0.0  ;;  %v699_v36 = vmul.f32 0.1, %v695_v34 }
 0x1dd   :  { %v700_v37 = vsel %vm698_vm7, %v695_v34, %v699_v36 }
 0x1de   :  { %1172 = vmatmul.mubr.msk.f32.vlgmr.msra.gmra.mrb[8].mxu0 %vm712_vm8, %v700_v37 }
 0x2b1   :  { %v782_v39 = vpop.f32.mrb[8].mxu0 }
 0x2b2   :  { %v783_v40 = vadd.f32 %v821_v38, %v782_v39  ;;  %v1173_v41 = vpop.f32.mrb[9].mxu0 }
 0x2b4   :  { %v787_v42 = vmul.f32 0.5, %v783_v40  ;;  %796 = vst.msk [vmem:[#allocation2] sm:$0xff] %vm90_vm0, %v783_v40 }
 0x2b6   :  { %v788_v43 = vmul.f32 1.442695, %v787_v42 }
 0x2b8   :  { %1317 = vpow2.f32 %v788_v43 }
 0x2c2   :  { %v1318_v44 = vpop.eup %1317 }
 0x2c3   :  { %791 = vrot.lane.b32.xlu0 %v1318_v44, %s1346_s4 }
 0x335   :  { %v792_v46 = vpop.permute.xlu0 %791 }
 0x336   :  { %v794_v47 = vmul.f32 %v792_v46, %v786_v45 }
 0x338   :  { %v795_v48 = vadd.f32 %v794_v47, %v783_v40 }
 0x33a   :  { %798 = vrot.lane.b32.xlu0 %v795_v48, %s1347_s19 }
 0x3ac   :  { %v799_v49 = vpop.permute.xlu0 %798 }
 0x3ad   :  { %802 = vst.msk [vmem:[#allocation2] sm:$0xff] %vm801_vm9, %v799_v49 }
 0x3ae   :  { %1330 = shalt.err (!%p1327_p4)
}
 0x3af   :  { %s1331_s23 = scalar_lea.hbm %s1605_s8, 128 }
 0x3b0   :  { %p1332_p5 = scmp.ne.s32.totalorder %s1605_s8, %s1331_s23  ;;  %p1335_p6 = scmp.lt.u32.totalorder %s1331_s23, %s1605_s8 }
 0x3b2   :  { %p1337_p7 = pnand %p1335_p6, %p1332_p5 }
 0x3b4   :  { %1340 = shalt.err (!%p1337_p7)
}
 0x3b5   :  { %812 = dma.vmem_to_hbm [thread:$0]  %s810_s20, 128, %s1605_s8, [#allocation3]  }
 0x3b6   :  { %1341 = dma.done.wait [#allocation3], 128  }
 0x3b7   :  { %1342 = vsyncadd [#allocation3], 4294967168 }
 0x3b8   :  { %816 = vsyncpa [#allocation3], 1 }

</bundles_post_ra>
